<compile_context>
chip_gen: v7x
topology: tpu7x:2x2x1
jax: 0.10.0
libtpu: 0.0.40
codegen_flags: <defaults>
</compile_context>

<pallas_src>
import functools

import jax
import jax.numpy as jnp
from jax.experimental import pallas as pl
from jax.experimental.pallas import tpu as pltpu


def _soft_ce_kernel(x_ref, t_ref, o_ref, *, tile_n, tiles_per_group, n_rows,
                    needs_mask):
    """One grid step processes a (tile_n, C) row tile of one row group.

    grid = (num_groups, tiles_per_group); axis 0 is "parallel" (two TensorCores
    on v7x), axis 1 is the sequential accumulation axis within a group.
    o_ref: (1, 8, 128) f32 block of the (num_groups, 8, 128) output; it stays
           resident in VMEM across axis 1 (constant index_map there) and is
           used directly as the group accumulator, written back once per group.
    """
    g = pl.program_id(0)
    i = pl.program_id(1)

    @pl.when(i == 0)
    def _():
        o_ref[...] = jnp.zeros(o_ref.shape, dtype=o_ref.dtype)

    x = x_ref[...].astype(jnp.float32)          # (TN, C)
    t = t_ref[...].astype(jnp.float32)          # (TN, C)

    if needs_mask:
        # Global (unclamped) row index of every row in this tile.  Rows >= N
        # are either the ragged tail of the last real block or a clamped
        # duplicate block; zero BOTH x and t there so stale / non-finite VMEM
        # contents cannot poison the sum (NaN * 0 = NaN) and each such row
        # contributes exactly 0 (its sum_t is 0).
        row0 = (g * tiles_per_group + i) * tile_n
        rows = row0 + jax.lax.broadcasted_iota(jnp.int32, (tile_n, 1), 0)
        valid = rows < n_rows                                        # (TN, 1)
        x = jnp.where(valid, x, 0.0)
        t = jnp.where(valid, t, 0.0)

    # Numerically stable LSE + well-conditioned fused loss:
    #   loss_row = sum_c -t*(x - m - lse) = lse*sum(t) - sum(t*(x - m))
    m = jnp.max(x, axis=-1, keepdims=True)                           # (TN, 1)
    xm = x - m
    lse = jnp.log(jnp.sum(jnp.exp(xm), axis=-1, keepdims=True))      # (TN, 1)
    sum_t = jnp.sum(t, axis=-1, keepdims=True)                       # (TN, 1)
    sum_txm = jnp.sum(t * xm, axis=-1, keepdims=True)                # (TN, 1)
    # TODO(synk): on v7x with small C (<~256) the four XLU row reductions can
    # become the bottleneck; sum_t / sum_txm / sum(exp(xm)) could be offloaded
    # to the otherwise-idle MXU as (TN, C) @ (C, 1) ones-vector matmuls.
    o_ref[...] += jnp.sum(lse * sum_t - sum_txm)   # scalar partial for group g


def _sublane_align(dtype):
    # f32 -> 8 rows, bf16/f16 -> 16 rows, int8/fp8 -> 32 rows per packed vreg.
    return 8 * max(1, 4 // jnp.dtype(dtype).itemsize)


def _vmem_capacity_bytes():
    # 128 MiB on v5e/v6e, 64 MiB per TensorCore on v7x.  The 64 MiB fallback is
    # safe on every generation if the query is unavailable.
    try:
        cap = getattr(pltpu.get_tpu_info(), "vmem_capacity_bytes", None)
        if cap:
            return int(cap)
    except Exception:
        pass
    return 64 << 20


def _default_num_groups():
    # v7x has two TensorCores per chip (fed via the "parallel" grid axis);
    # v5e/v6e have one, where a second group is just a serial split.
    try:
        kind = (jax.devices()[0].device_kind or "").lower()
    except Exception:
        kind = ""
    single_tc = any(tag in kind for tag in
                    ("v5e", "v5 lite", "v5lite", "v6e", "v6 lite", "v6lite"))
    return 1 if single_tc else 2


def soft_target_cross_entropy(x, target, *, num_groups=None,
                              vmem_limit_bytes=None):
    """loss = mean_i sum_c (-target[i,c] * log_softmax(x, -1)[i,c]).

    Memory-bound streaming kernel.  bf16/f16 x and target are accepted (and
    recommended: they halve HBM traffic); the LSE math runs in f32 in VMEM.
    """
    assert x.shape == target.shape and x.ndim == 2
    n, c = x.shape

    if num_groups is None:
        num_groups = _default_num_groups()

    row_align = max(_sublane_align(x.dtype), _sublane_align(target.dtype))
    xb = jnp.dtype(x.dtype).itemsize
    tb = jnp.dtype(target.dtype).itemsize

    # VMEM sizing: ~3/4 of physical VMEM (~96 MiB v5e/v6e, ~48 MiB v7x),
    # counting double-buffered input tiles plus ~4 tile-sized f32 temporaries
    # for the in-kernel upcast/exp/products, with fixed headroom for the
    # output block and compiler scratch.
    if vmem_limit_bytes is None:
        vmem_limit_bytes = (_vmem_capacity_bytes() * 3) // 4
    bytes_per_elem = 2 * (xb + tb) + 4 * 4
    headroom = 4 << 20
    max_tile_elems = max(1, (int(vmem_limit_bytes) - headroom) // bytes_per_elem)
    max_rows_vmem = max(row_align,
                        (max_tile_elems // c) // row_align * row_align)
    # TODO(synk): for class counts so large that even a row_align-row tile
    # exceeds the budget, add a class-axis grid dim with an online
    # (flash-style) max/LSE accumulation per row; as-is we fall back to
    # row_align rows and rely on the vmem_limit headroom.

    # Biggest row tile that fits the budget, capped at one group's (aligned)
    # share of the batch -- no arbitrary row cap, so per-step bytes stay large.
    rows_per_group = pl.cdiv(n, num_groups)
    rows_per_group_aligned = pl.cdiv(rows_per_group, row_align) * row_align
    tile_n = min(max_rows_vmem, rows_per_group_aligned)

    total_blocks = pl.cdiv(n, tile_n)        # blocks containing >= 1 real row
    num_groups = max(1, min(num_groups, total_blocks))
    tiles_per_group = pl.cdiv(total_blocks, num_groups)
    covered_rows = num_groups * tiles_per_group * tile_n
    needs_mask = covered_rows != n           # ragged tail handled in-kernel
    needs_clamp = num_groups * tiles_per_group > total_blocks

    if needs_clamp:
        # Grid points past the end of the array re-read the last real block
        # (their rows are masked to zero in-kernel), keeping DMAs in bounds.
        last_block = total_blocks - 1

        def row_map(g, i):
            return (jnp.minimum(g * tiles_per_group + i, last_block), 0)
    else:
        def row_map(g, i):
            return (g * tiles_per_group + i, 0)

    kernel = functools.partial(
        _soft_ce_kernel, tile_n=tile_n, tiles_per_group=tiles_per_group,
        n_rows=n, needs_mask=needs_mask)

    out = pl.pallas_call(
        kernel,
        out_shape=jax.ShapeDtypeStruct((num_groups, 8, 128), jnp.float32),
        grid_spec=pltpu.PrefetchScalarGridSpec(
            num_scalar_prefetch=0,
            grid=(num_groups, tiles_per_group),
            in_specs=[
                pl.BlockSpec((tile_n, c), row_map),
                pl.BlockSpec((tile_n, c), row_map),
            ],
            out_specs=pl.BlockSpec((1, 8, 128), lambda g, i: (g, 0, 0)),
        ),
        compiler_params=pltpu.CompilerParams(
            dimension_semantics=("parallel", "arbitrary"),
            vmem_limit_bytes=int(vmem_limit_bytes),
        ),
    )(x, target)

    partials = out[:, 0, 0]                      # one scalar per row group
    return jnp.sum(partials) / jnp.float32(n)    # mean over the true batch


def _reference(x, target):
    logp = jax.nn.log_softmax(x.astype(jnp.float32), axis=-1)
    return jnp.mean(jnp.sum(-target.astype(jnp.float32) * logp, axis=-1))


if __name__ == "__main__":
    key = jax.random.PRNGKey(0)
    k1, k2, k3, k4, k5, k6 = jax.random.split(key, 6)

    # Small (batch, num_classes) demo shapes.
    N, C = 16, 32
    x = jax.random.normal(k1, (N, C), dtype=jnp.float32)
    target = jax.nn.softmax(jax.random.normal(k2, (N, C), dtype=jnp.float32),
                            axis=-1)
    loss = jax.block_until_ready(soft_target_cross_entropy(x, target))
    ref = _reference(x, target)
    assert jnp.allclose(loss, ref, atol=1e-5, rtol=1e-5), (loss, ref)

    # Ragged-tail masking path (batch not divisible by the tile).
    N2, C2 = 13, 40
    x2 = jax.random.normal(k3, (N2, C2), dtype=jnp.float32)
    target2 = jax.nn.softmax(jax.random.normal(k4, (N2, C2), dtype=jnp.float32),
                             axis=-1)
    loss2 = jax.block_until_ready(soft_target_cross_entropy(x2, target2))
    ref2 = _reference(x2, target2)
    assert jnp.allclose(loss2, ref2, atol=1e-5, rtol=1e-5), (loss2, ref2)

    # Force two groups and a tiny VMEM budget to exercise the clamped
    # out-of-range-block + mask path.
    N3, C3 = 20, 48
    x3 = jax.random.normal(k5, (N3, C3), dtype=jnp.float32)
    target3 = jax.nn.softmax(jax.random.normal(k6, (N3, C3), dtype=jnp.float32),
                             axis=-1)
    loss3 = jax.block_until_ready(
        soft_target_cross_entropy(x3, target3, num_groups=2,
                                  vmem_limit_bytes=(4 << 20) + 4096))
    ref3 = _reference(x3, target3)
    assert jnp.allclose(loss3, ref3, atol=1e-5, rtol=1e-5), (loss3, ref3)

    print("KERNEL_OK")
</pallas_src>

<mosaic_0001>
module attributes {stable_mosaic.version = 11 : i64} {
  func.func @_soft_ce_kernel(%arg0: i32, %arg1: i32, %arg2: memref<8x32xf32, #tpu.memory_space<vmem>>, %arg3: memref<8x32xf32, #tpu.memory_space<vmem>>, %arg4: memref<1x8x128xf32, #tpu.memory_space<vmem>>) attributes {dimension_semantics = [#tpu.dimension_semantics<parallel>, #tpu.dimension_semantics<arbitrary>], iteration_bounds = array<i64: 2, 1>, scalar_prefetch = 0 : i64, scratch_operands = 0 : i64, tpu.core_type = #tpu.core_type<tc>, window_params = [{transform_indices = @transform_0, window_bounds = array<i64: 8, 32>}, {transform_indices = @transform_1, window_bounds = array<i64: 8, 32>}, {transform_indices = @transform_2, window_bounds = array<i64: 1, 8, 128>}]} {
    %c0_i32 = arith.constant 0 : i32
    %0 = arith.cmpi eq, %arg1, %c0_i32 : i32
    %1 = arith.extui %0 : i1 to i32
    %c0_i32_0 = arith.constant 0 : i32
    %2 = arith.cmpi ne, %1, %c0_i32_0 : i32
    scf.if %2 {
      %cst_14 = arith.constant 0.000000e+00 : f32
      %28 = vector.broadcast %cst_14 : f32 to vector<1x8x128xf32>
      %c0_15 = arith.constant 0 : index
      %c0_16 = arith.constant 0 : index
      %c0_17 = arith.constant 0 : index
      %29 = vector.load %arg4[%c0_15, %c0_16, %c0_17] : memref<1x8x128xf32, #tpu.memory_space<vmem>>, vector<1x8x128xf32>
      tpu.vector_store %arg4[%c0_15, %c0_16, %c0_17], %28 {strides = array<i32>} : memref<1x8x128xf32, #tpu.memory_space<vmem>>, vector<1x8x128xf32>,
    } else {
    }
    %c0 = arith.constant 0 : index
    %c0_1 = arith.constant 0 : index
    %3 = vector.load %arg2[%c0, %c0_1] : memref<8x32xf32, #tpu.memory_space<vmem>>, vector<8x32xf32>
    %c0_2 = arith.constant 0 : index
    %c0_3 = arith.constant 0 : index
    %4 = vector.load %arg3[%c0_2, %c0_3] : memref<8x32xf32, #tpu.memory_space<vmem>>, vector<8x32xf32>
    %cst = arith.constant dense<0xFF800000> : vector<8xf32>
    %5 = vector.multi_reduction <maximumf>, %3, %cst [1] : vector<8x32xf32> to vector<8xf32>
    %6 = vector.shape_cast %5 : vector<8xf32> to vector<8x1xf32>
    %7 = vector.broadcast %6 : vector<8x1xf32> to vector<8x32xf32>
    %8 = arith.subf %3, %7 : vector<8x32xf32>
    %9 = math.exp %8 : vector<8x32xf32>
    %cst_4 = arith.constant dense<0.000000e+00> : vector<8xf32>
    %10 = vector.multi_reduction <add>, %9, %cst_4 [1] : vector<8x32xf32> to vector<8xf32>
    %11 = vector.shape_cast %10 : vector<8xf32> to vector<8x1xf32>
    %12 = math.log %11 : vector<8x1xf32>
    %cst_5 = arith.constant dense<0.000000e+00> : vector<8xf32>
    %13 = vector.multi_reduction <add>, %4, %cst_5 [1] : vector<8x32xf32> to vector<8xf32>
    %14 = vector.shape_cast %13 : vector<8xf32> to vector<8x1xf32>
    %15 = arith.mulf %4, %8 : vector<8x32xf32>
    %cst_6 = arith.constant dense<0.000000e+00> : vector<8xf32>
    %16 = vector.multi_reduction <add>, %15, %cst_6 [1] : vector<8x32xf32> to vector<8xf32>
    %17 = vector.shape_cast %16 : vector<8xf32> to vector<8x1xf32>
    %c0_7 = arith.constant 0 : index
    %c0_8 = arith.constant 0 : index
    %c0_9 = arith.constant 0 : index
    %18 = vector.load %arg4[%c0_7, %c0_8, %c0_9] : memref<1x8x128xf32, #tpu.memory_space<vmem>>, vector<1x8x128xf32>
    %19 = arith.mulf %12, %14 : vector<8x1xf32>
    %20 = arith.subf %19, %17 : vector<8x1xf32>
    %21 = vector.shape_cast %20 : vector<8x1xf32> to vector<1x8x1xf32>
    %cst_10 = arith.constant dense<0.000000e+00> : vector<1xf32>
    %22 = vector.multi_reduction <add>, %21, %cst_10 [1, 2] : vector<1x8x1xf32> to vector<1xf32>
    %23 = vector.shape_cast %22 : vector<1xf32> to vector<1x1x1xf32>
    %24 = vector.extract %23[0, 0, 0] : f32 from vector<1x1x1xf32>
    %25 = vector.broadcast %24 : f32 to vector<1x8x128xf32>
    %26 = arith.addf %18, %25 : vector<1x8x128xf32>
    %c0_11 = arith.constant 0 : index
    %c0_12 = arith.constant 0 : index
    %c0_13 = arith.constant 0 : index
    %27 = vector.load %arg4[%c0_11, %c0_12, %c0_13] : memref<1x8x128xf32, #tpu.memory_space<vmem>>, vector<1x8x128xf32>
    tpu.vector_store %arg4[%c0_11, %c0_12, %c0_13], %26 {strides = array<i32>} : memref<1x8x128xf32, #tpu.memory_space<vmem>>, vector<1x8x128xf32>,
    return
  }
  func.func @transform_0(%arg0: i32, %arg1: i32) -> (i32, i32) {
    %c1_i32 = arith.constant 1 : i32
    %0 = arith.muli %arg0, %c1_i32 : i32
    %1 = arith.addi %0, %arg1 : i32
    %c0_i32 = arith.constant 0 : i32
    %c0_i32_0 = arith.constant 0 : i32
    return %1, %c0_i32 : i32, i32
  }
  func.func @transform_1(%arg0: i32, %arg1: i32) -> (i32, i32) {
    %c1_i32 = arith.constant 1 : i32
    %0 = arith.muli %arg0, %c1_i32 : i32
    %1 = arith.addi %0, %arg1 : i32
    %c0_i32 = arith.constant 0 : i32
    %c0_i32_0 = arith.constant 0 : i32
    return %1, %c0_i32 : i32, i32
  }
  func.func @transform_2(%arg0: i32, %arg1: i32) -> (i32, i32, i32) {
    %c0_i32 = arith.constant 0 : i32
    %c0_i32_0 = arith.constant 0 : i32
    %c0_i32_1 = arith.constant 0 : i32
    return %arg0, %c0_i32, %c0_i32_0 : i32, i32, i32
  }
}

</mosaic_0001>

<bundles_post_ra>
// kernel: tpu_custom_call.1
= control target key start
LH: loop header
LB: loop body
LE: loop exit
PB: predicated region body
PF: predicated region fallthrough
CT: control target
= control target key end

     0   :  { %7 = vsyncpa [#allocation3], 0  ;;  %s857_s0 = inlined_call_operand.hbm [shape: f32[16,32], index: 0, kind: input, shape index: {}]   ;;  %s858_s1 = inlined_call_operand.hbm [shape: f32[16,32], index: 1, kind: input, shape index: {}]   ;;  %s859_s2 = inlined_call_operand.hbm [shape: f32[2,8,128], index: 2, kind: output, shape index: {}]  }
   0x1   :  { %9 = vsyncpa [#allocation3 + $0x1], 0 }
   0x2   :  { %10 = vsyncpa [#allocation6], 0 }
   0x3   :  { %12 = vsyncpa [#allocation6 + $0x1], 0 }
   0x4   :  { %13 = vsyncpa [#allocation4], 0 }
   0x5   :  { %15 = vsyncpa [#allocation4 + $0x1], 0  ;;  %s632_s9 = smov 0   ;;  %s634_s10 = smov 0  }
   0x6   :  { %s636_s11 = smov 0   ;;  %s638_s12 = smov 0  }
   0x7   :  { %s640_s13 = smov 0   ;;  %s642_s14 = smov 0  }
   0x8 LB: > { %s376_s15 = sadd.s32 4294967295, %s612_s14   ;;  %s377_s16 = sadd.s32 4294967294, %s612_s14   ;;  %s612_s14 = sphi %s642_s14, %s21_s14   ;;  %s608_s13 = sphi %s640_s13, %s879_s13   ;;  %s604_s12 = sphi %s638_s12, %s878_s12   ;;  %s600_s11 = sphi %s636_s11, %s877_s11   ;;  %s596_s10 = sphi %s634_s10, %s876_s10   ;;  %s592_s9 = sphi %s632_s9, %s875_s9  }
   0x9   : > { %s33_s17 = sadd.s32 1, %s608_s13  ;;  %s42_s18 = sadd.s32 1, %s600_s11 }
   0xa   : > { %p35_p0 = scmp.ge.s32.totalorder %s33_s17, 2  ;;  %p49_p1 = scmp.ne.s32.totalorder %s600_s11, %s596_s10 }
   0xb   : > { %p50_p2 = scmp.eq.s32.totalorder %s612_s14, 0  ;;  %p55_p3 = scmp.ne.s32.totalorder %s596_s10, %s592_s9 }
   0xc   : > { %s881_s17 = smov (%p35_p0, %s33_s17), 0  ;;  %p56_p5 = scmp.eq.s32.totalorder %s376_s15, 0 }
   0xd   : > { %p673_p4 = por %p50_p2, %p49_p1  ;;  %s39_s20 = ssub.s32 %s608_s13, %s881_s17 }
   0xe   : > { %p107_p6 = scmp.eq.s32.totalorder %s376_s15, 1  ;;  %p40_p7 = scmp.eq.s32.totalorder %s39_s20, 0 }
   0xf   : > { %p679_p8 = por %p56_p5, %p55_p3  ;;  %p113_p10 = scmp.eq.s32.totalorder %s377_s16, 1 }
  0x10   : > { %p683_p9 = por %p107_p6, %p49_p1  ;;  %p411_p13 = scmp.lt.s32.totalorder %s612_s14, 2 }
  0x11   : > { %s863_s21 = scalar_select %p679_p8, 1, 0 }
  0x12   : > { %s864_s22 = scalar_select %p683_p9, 1, 0 }
  0x13   : > { %s688_s23 = scalar_select %p40_p7, %s600_s11, %s42_s18  }
  0x14   : > { %p690_p11 = por %p113_p10, %p55_p3  ;;  %s697_s25 = sand.u32 1, %s600_s11  }
  0x15   : > { %s380_s26 = sshll.u32 %s697_s25, 3  ;;  %s381_s27 = sshll.u32 %s608_s13, 7 }
  0x16   : > { %s865_s24 = scalar_select %p690_p11, 1, 0 }
  0x17   : > { %s706_s30 = scalar_lea.hbm %s857_s0, %s381_s27  ;;  %s137_s3 = scalar_lea.vmem [#allocation2], %s380_s26 }
  0x18   : > { %s145_s4 = sshll.u32 %s137_s3, 4  ;;  %p714_p0 = pnand %p411_p13, %p673_p4  ;;  %s710_s4 = int_to_ptr.vmem [resolvable:$true] %s145_s4 }
  0x19   : > { %s134_s6 = scalar_lea.sflag [#allocation3], %s697_s25  ;;  %s466_s7 = scalar_lea.hbm %s706_s30, 128 }
  0x1a   : > { %p467_p3 = scmp.ne.s32.totalorder %s706_s30, %s466_s7  ;;  %p468_p5 = pneg %p714_p0 }
  0x1b   : > { %s471_s16 = scalar_lea.hbm %s857_s0, 256  ;;  %p472_p4 = scmp.lt.u32.totalorder %s706_s30, %s857_s0 }
  0x1c   : > { %p469_p6 = pnand %p468_p5, %p467_p3  ;;  %p473_p10 = scmp.lt.u32.totalorder %s471_s16, %s466_s7 }
  0x1d   : > { %p475_p12 = scmp.lt.u32.totalorder %s466_s7, %s706_s30 }
  0x1e   : > { %p470_p7 = pneg %p469_p6  ;;  %p474_p13 = por %p473_p10, %p472_p4 }
  0x20   : > { %p476_p1 = por %p475_p12, %p474_p13 }
  0x22   : > { %p477_p2 = pnand %p476_p1, %p470_p7 }
  0x24   : > { %480 = shalt.err (!%p477_p2)
}
  0x25   : > { %s481_s20 = scalar_lea.vmem %s710_s4, 128  ;;  %s614_s28 = smov [#allocation2]  }
  0x26   : > { %p482_p3 = scmp.ne.s32.totalorder %s710_s4, %s481_s20  ;;  %s486_s29 = sshll.u32 %s614_s28, 4  ;;  %s487_s29 = int_to_ptr.vmem [resolvable:$false] %s486_s29 }
  0x27   : > { %s488_s3 = scalar_lea.vmem %s487_s29, 256  ;;  %p489_p9 = scmp.lt.s32.totalorder %s710_s4, %s487_s29 }
  0x28   : > { %p484_p6 = pnand %p482_p3, %p468_p5  ;;  %p490_p4 = scmp.lt.s32.totalorder %s488_s3, %s481_s20 }
  0x2a   : > { %p485_p11 = pneg %p484_p6  ;;  %p491_p10 = por %p490_p4, %p489_p9 }
  0x2c   : > { %p492_p12 = pnand %p491_p10, %p485_p11 }
  0x2e   : > { %495 = shalt.err (!%p492_p12)
}
  0x2f   : > { %403 = dma.hbm_to_vmem [thread:$0]  (!%p714_p0), %s706_s30, 128, %s710_s4, %s134_s6  }
  0x30   : > { %p867_p1 = scmp.lt.s32.totalorder %s612_s14, 3  ;;  %p868_p2 = scmp.ge.s32.totalorder %s612_s14, 1 }
  0x31   : > { %s759_s16 = scalar_lea.hbm %s858_s1, %s381_s27  ;;  %s156_s18 = scalar_lea.vmem [#allocation5], %s380_s26 }
  0x32   : > { %p750_p7 = pnand %p868_p2, %p867_p1  ;;  %s164_s19 = sshll.u32 %s156_s18, 4  ;;  %s165_s19 = int_to_ptr.vmem [resolvable:$true] %s164_s19 }
  0x33   : > { %s153_s30 = scalar_lea.sflag [#allocation6], %s697_s25  ;;  %s496_s4 = scalar_lea.hbm %s759_s16, 128 }
  0x34   : > { %s869_s7 = scalar_select %p750_p7, 1, 0 }
  0x35   : > { %p497_p9 = scmp.ne.s32.totalorder %s759_s16, %s496_s4  ;;  %s501_s27 = scalar_lea.hbm %s858_s1, 256 }
  0x36   : > { %p502_p3 = scmp.lt.u32.totalorder %s759_s16, %s858_s1  ;;  %p503_p6 = scmp.lt.u32.totalorder %s501_s27, %s496_s4 }
  0x37   : > { %p499_p11 = pnand %p497_p9, %p468_p5  ;;  %p505_p10 = scmp.lt.u32.totalorder %s496_s4, %s759_s16 }
  0x38   : > { %p504_p4 = por %p503_p6, %p502_p3 }
  0x39   : > { %p500_p13 = pneg %p499_p11 }
  0x3a   : > { %p506_p12 = por %p505_p10, %p504_p4 }
  0x3c   : > { %p507_p1 = pnand %p506_p12, %p500_p13 }
  0x3e   : > { %510 = shalt.err (!%p507_p1)
}
  0x3f   : > { %s511_s25 = scalar_lea.vmem %s165_s19, 128  ;;  %s615_s26 = smov [#allocation5]  }
  0x40   : > { %p512_p2 = scmp.ne.s32.totalorder %s165_s19, %s511_s25  ;;  %s516_s3 = sshll.u32 %s615_s26, 4  ;;  %s517_s3 = int_to_ptr.vmem [resolvable:$false] %s516_s3 }
  0x41   : > { %s518_s8 = scalar_lea.vmem %s517_s3, 256  ;;  %p519_p8 = scmp.lt.s32.totalorder %s165_s19, %s517_s3 }
  0x42   : > { %p514_p9 = pnand %p512_p2, %p468_p5  ;;  %p520_p7 = scmp.lt.s32.totalorder %s518_s8, %s511_s25 }
  0x44   : > { %p515_p11 = pneg %p514_p9  ;;  %p521_p3 = por %p520_p7, %p519_p8 }
  0x46   : > { %p522_p6 = pnand %p521_p3, %p515_p11 }
  0x48   : > { %525 = shalt.err (!%p522_p6)
}
  0x49   : > { %406 = dma.hbm_to_vmem [thread:$0]  (!%p714_p0), %s759_s16, 128, %s165_s19, %s153_s30  }
  0x4a   : > { %p870_p13 = scmp.ne.s32.totalorder %s869_s7, 0 }
  0x4b   : > { %s786_s15 = sand.u32 (!%p870_p13), 1, %s596_s10   ;;  %p871_p8 = scmp.ne.s32.totalorder (!%p870_p13), %s863_s21, 0 }
  0x4c   : > { %173 = sbr.rel (%p870_p13) target bundleno = 625 (0x271), region = 28  ;;  %s789_s18 = sshll.u32 (!%p870_p13), %s786_s15, 3 }
  0x4d   : > { %s176_s4 = scalar_lea.sflag (!%p870_p13), [#allocation3], %s786_s15  ;;  %s179_s6 = scalar_lea.vmem (!%p870_p13), [#allocation2], %s789_s18 }
  0x53   : > { %579 = dma.done.wait (%p871_p8), %s176_s4, 128  }
  0x54   : > { %581 = vsyncadd (%p871_p8), %s176_s4, 4294967168  ;;  %s185_s5 = scalar_lea.sflag [#allocation6], %s786_s15  ;;  %s188_s7 = scalar_lea.vmem [#allocation5], %s789_s18 }
  0x55   : > { %583 = dma.done.wait (%p871_p8), %s185_s5, 128  }
  0x56   : > { %585 = vsyncadd (%p871_p8), %s185_s5, 4294967168  ;;  %vm223_vm0 = vcmask 261120   ;;  %v221_v0 = vld [vmem:[%s179_s6] sm:$0xff]  ;;  %v222_v2 = vld [vmem:[%s188_s7] sm:$0xff]  ;;  %vm245_vm1 = vcmask 7168   ;;  %s389_s21 = sshll.u32 %s604_s12, 7 }
  0x57   : > { %v224_v1 = vsel %vm223_vm0, %v221_v0, -inf  ;;  %v235_v3 = vsel %vm223_vm0, %v222_v2, 0.0  ;;  %s213_s16 = scalar_lea.vmem [#allocation7], %s789_s18  ;;  %s808_s28 = scalar_lea.hbm %s859_s2, %s389_s21 }
  0x58   : > { %225 = vmax.xlane.f32.xlu0 %v224_v1  ;;  %236 = vadd.xlane.f32.xlu1 %v235_v3  ;;  %s273_s19 = sshll.u32 %s213_s16, 4  ;;  %s260_s29 = scalar_lea.sflag [#allocation4], %s786_s15  ;;  %s810_s19 = int_to_ptr.vmem [resolvable:$true] %s273_s19 }
  0x59   : > { %s526_s25 = scalar_lea.vmem %s810_s19, 128  ;;  %p872_p5 = scmp.ne.s32.totalorder %s864_s22, 0 }
  0x5a   : > { %p527_p0 = scmp.ne.s32.totalorder %s810_s19, %s526_s25  ;;  %s616_s12 = smov [#allocation7]  }
  0x5b   : > { %s530_s26 = sshll.u32 %s616_s12, 4  ;;  %s531_s26 = int_to_ptr.vmem [resolvable:$false] %s530_s26 }
  0x5c   : > { %p528_p7 = pnand %p527_p0, %p872_p5  ;;  %s532_s3 = scalar_lea.vmem %s531_s26, 256 }
  0x5d   : > { %p533_p10 = scmp.lt.s32.totalorder %s810_s19, %s531_s26  ;;  %p534_p12 = scmp.lt.s32.totalorder %s532_s3, %s526_s25 }
  0x5e   : > { %p529_p4 = pneg %p528_p7 }
  0x5f   : > { %p535_p1 = por %p534_p12, %p533_p10 }
  0x61   : > { %p536_p2 = pnand %p535_p1, %p529_p4 }
  0xe5   : > { %v226_v4 = vpop.xlane.xlu0 %225  ;;  %v237_v12 = vpop.xlane.xlu1 %236 }
  0xe6   : > { %v227_v5 = vsub.f32 %v221_v0, %v226_v4 }
  0xe8   : > { %v228_v6 = vmul.f32 1.442695, %v227_v5  ;;  %v238_v7 = vmul.f32 %v227_v5, %v222_v2 }
  0xea   : > { %462 = vpow2.f32 %v228_v6  ;;  %v239_v8 = vsel %vm223_vm0, %v238_v7, 0.0 }
  0xeb   : > { %240 = vadd.xlane.f32.xlu1 %v239_v8 }
  0xf4   : > { %v463_v9 = vpop.eup %462 }
  0xf5   : > { %v230_v10 = vsel %vm223_vm0, %v463_v9, 0.0 }
  0xf6   : > { %231 = vadd.xlane.f32.xlu0 %v230_v10 }
 0x178   : > { %v241_v16 = vpop.xlane.xlu1 %240 }
 0x183   : > { %v232_v11 = vpop.xlane.xlu0 %231 }
 0x184   : > { %464 = vlog2.f32 %v232_v11 }
 0x18e   : > { %v465_v13 = vpop.eup %464 }
 0x18f   : > { %v234_v14 = vmul.f32 0.6931472, %v465_v13 }
 0x191   : > { %v243_v15 = vmul.f32 %v237_v12, %v234_v14 }
 0x193   : > { %v244_v17 = vsub.f32 %v243_v15, %v241_v16 }
 0x195   : > { %v246_v18 = vsel %vm245_vm1, %v244_v17, 0.0 }
 0x196   : > { %247 = vadd.xlane.f32.xlu0 %v246_v18 }
 0x223   : > { %v248_v19 = vpop.xlane.xlu0 %247 }
 0x224   : > { %v249_v20 = vrot.slane %v248_v19, 4 }
 0x226   : > { %v250_v21 = vadd.f32 %v249_v20, %v248_v19 }
 0x228   : > { %v251_v22 = vrot.slane %v250_v21, 2 }
 0x22a   : > { %v252_v23 = vadd.f32 %v251_v22, %v250_v21 }
 0x22c   : > { %v253_v24 = vrot.slane %v252_v23, 1 }
 0x22e   : > { %v254_v25 = vadd.f32 %v253_v24, %v252_v23 }
 0x230   : > { %392 = vpush %v254_v25 }
 0x261   : > { %s393_s30 = spop %392 }
 0x262   : > { %v256_v26 = vstv %s393_s30 }
 0x263   : > { %258 = vst [vmem:[%s213_s16] sm:$0xff] %v256_v26 }
 0x264   : > { %539 = shalt.err (!%p536_p2)
}
 0x265   : > { %s540_s8 = scalar_lea.hbm %s808_s28, 128  ;;  %s544_s4 = scalar_lea.hbm %s859_s2, 256 }
 0x266   : > { %p541_p9 = scmp.ne.s32.totalorder %s808_s28, %s540_s8  ;;  %p545_p6 = scmp.lt.u32.totalorder %s808_s28, %s859_s2 }
 0x267   : > { %p546_p13 = scmp.lt.u32.totalorder %s544_s4, %s540_s8  ;;  %p548_p0 = scmp.lt.u32.totalorder %s540_s8, %s808_s28 }
 0x268   : > { %p542_p11 = pnand %p541_p9, %p872_p5 }
 0x269   : > { %p547_p8 = por %p546_p13, %p545_p6 }
 0x26a   : > { %p543_p3 = pneg %p542_p11 }
 0x26b   : > { %p549_p7 = por %p548_p0, %p547_p8 }
 0x26d   : > { %p550_p4 = pnand %p549_p7, %p543_p3 }
 0x26f   : > { %553 = shalt.err (!%p550_p4)
}
 0x270   : > { %398 = dma.vmem_to_hbm [thread:$0]  (%p872_p5), %s810_s19, 128, %s808_s28, %s260_s29  }
 0x271 PF: > { %s285_s7 = sand.u32 1, %s592_s9   ;;  %p873_p10 = scmp.ne.s32.totalorder %s865_s24, 0 }
 0x272   : > { %p874_p12 = scmp.ge.s32.totalorder %s612_s14, 2  ;;  %s286_s21 = scalar_lea.sflag [#allocation4], %s285_s7 }
 0x274   : > { %p408_p1 = pnand %p874_p12, %p873_p10 }
 0x276   : > { %587 = dma.done.wait (!%p408_p1), %s286_s21, 128  }
 0x277   : > { %589 = vsyncadd (!%p408_p1), %s286_s21, 4294967168  ;;  %s21_s14 = sadd.s32 1, %s612_s14   ;;  %s875_s9 = smov %s596_s10 }
 0x278   : > { %p18_p2 = scmp.ge.s32.totalorder %s21_s14, 4   ;;  %s876_s10 = smov %s600_s11 }
 0x279   : > { %s877_s11 = smov %s688_s23  ;;  %s878_s12 = smov %s608_s13 }
 0x27a   : > { %s879_s13 = smov %s881_s17  ;;  %20 = sbr.rel (!%p18_p2) target bundleno = 8 (0x8), region = 90 }
 0x281   :  { %291 = vsyncpa [#allocation3], 1 }
 0x282   :  { %293 = vsyncpa [#allocation3 + $0x1], 1 }
 0x283   :  { %294 = vsyncpa [#allocation6], 1 }
 0x284   :  { %296 = vsyncpa [#allocation6 + $0x1], 1 }
 0x285   :  { %297 = vsyncpa [#allocation4], 1 }
 0x286   :  { %299 = vsyncpa [#allocation4 + $0x1], 1 }

</bundles_post_ra>
